<compile_context>
chip_gen: v7x
topology: tpu7x:2x2x1
jax: 0.10.0
libtpu: 0.0.40
codegen_flags: <defaults>
</compile_context>

<pallas_src>
import math

import jax
import jax.numpy as jnp
from jax import lax
from jax.experimental import pallas as pl
from jax.experimental.pallas import tpu as pltpu

N_IN, N_HID, N_OUT = 4, 10, 2
BASE = 1024  # 8 sublanes * 128 lanes: minimum batch tile


def _policy_kernel(x_ref, w1_ref, b1_ref, w2_ref, b2_ref, o_ref):
    """x_ref: (4, S, 128) f32 VMEM; o_ref: (2, S, 128) f32 VMEM; params in SMEM."""
    S = x_ref.shape[1]
    cs = 32 if S % 32 == 0 else 8          # sublanes per inner chunk (bounds live vregs)
    nchunks = S // cs

    def chunk(c, carry):
        s0 = pl.multiple_of(c * cs, 8)
        sl = pl.ds(s0, cs)

        # 4 input-feature slabs for this chunk, batch dense on (sublane, lane).
        x = [x_ref[k, sl, :] for k in range(N_IN)]          # 4 x (cs, 128)

        # Fused Linear(4,10) + ReLU + Linear(10,2): each hidden slab is
        # consumed into the two logit accumulators immediately.
        acc0 = jnp.full((cs, 128), b2_ref[0], dtype=jnp.float32)
        acc1 = jnp.full((cs, 128), b2_ref[1], dtype=jnp.float32)
        for j in range(N_HID):
            h = x[0] * w1_ref[0, j]
            for k in range(1, N_IN):
                h = h + x[k] * w1_ref[k, j]
            h = jnp.maximum(h + b1_ref[j], 0.0)
            acc0 = acc0 + h * w2_ref[j, 0]
            acc1 = acc1 + h * w2_ref[j, 1]

        # 2-class softmax via the sigmoid identity (exact; p0 + p1 == 1).
        p0 = 1.0 / (1.0 + jnp.exp(acc1 - acc0))
        o_ref[0, sl, :] = p0
        o_ref[1, sl, :] = 1.0 - p0
        return carry

    lax.fori_loop(0, nchunks, chunk, 0, unroll=True)


def _round_up(n, m):
    return ((n + m - 1) // m) * m


def policy_network_forward(x, w1, b1, w2, b2, *, tb=8192):
    """x: (B, 4) or (4,) f32 -> (B, 2) / (2,) action probabilities (softmax over dim=-1)."""
    squeeze = x.ndim == 1
    if squeeze:
        x = x[None, :]
    B = x.shape[0]

    # Batch tile: multiple of 1024 (8 sublanes x 128 lanes), no larger than the
    # padded batch; keep >= 2 grid steps when the batch allows it (v7x: 2 TCs).
    Bp_min = _round_up(B, BASE)
    tb = max(BASE, min(_round_up(tb, BASE), Bp_min))
    if Bp_min >= 2 * BASE and tb > Bp_min // 2:
        tb = max(BASE, ((Bp_min // 2) // BASE) * BASE)
    Bp = _round_up(B, tb)
    S = tb // 128
    grid = (Bp // tb,)

    # One transpose + pad so batch maps to (sublane, lane); then a pure reshape.
    xT = jnp.pad(x.astype(jnp.float32).T, ((0, 0), (0, Bp - B)))      # (4, Bp)
    xT = xT.reshape(N_IN, Bp // 128, 128)                             # (4, Bp/128, 128)

    outT = pl.pallas_call(
        _policy_kernel,
        out_shape=jax.ShapeDtypeStruct((N_OUT, Bp // 128, 128), jnp.float32),
        grid=grid,
        in_specs=[
            pl.BlockSpec((N_IN, S, 128), lambda i: (0, i, 0)),        # x tile (VMEM)
            pl.BlockSpec(memory_space=pltpu.SMEM),                    # w1 (4, 10)  scalars
            pl.BlockSpec(memory_space=pltpu.SMEM),                    # b1 (10,)    scalars
            pl.BlockSpec(memory_space=pltpu.SMEM),                    # w2 (10, 2)  scalars
            pl.BlockSpec(memory_space=pltpu.SMEM),                    # b2 (2,)     scalars
        ],
        out_specs=pl.BlockSpec((N_OUT, S, 128), lambda i: (0, i, 0)),
        compiler_params=pltpu.CompilerParams(
            dimension_semantics=("parallel",)),                       # v7x: shard over 2 TCs
    )(xT, w1, b1, w2, b2)

    out = outT.reshape(N_OUT, Bp)[:, :B].T                            # back to (B, 2)
    return out[0] if squeeze else out


def init_params(key):
    """PyTorch Linear default init U[-1/sqrt(fan_in), +1/sqrt(fan_in)]; weights stored (in, out)."""
    k1, k2, k3, k4 = jax.random.split(key, 4)
    bound1 = 1.0 / math.sqrt(N_IN)
    bound2 = 1.0 / math.sqrt(N_HID)
    w1 = jax.random.uniform(k1, (N_IN, N_HID), jnp.float32, -bound1, bound1)
    b1 = jax.random.uniform(k2, (N_HID,), jnp.float32, -bound1, bound1)
    w2 = jax.random.uniform(k3, (N_HID, N_OUT), jnp.float32, -bound2, bound2)
    b2 = jax.random.uniform(k4, (N_OUT,), jnp.float32, -bound2, bound2)
    return w1, b1, w2, b2


def _reference(x, w1, b1, w2, b2):
    hp = jax.lax.Precision.HIGHEST
    h = jnp.maximum(jnp.dot(x, w1, precision=hp) + b1, 0.0)
    return jax.nn.softmax(jnp.dot(h, w2, precision=hp) + b2, axis=-1)


if __name__ == "__main__":
    key = jax.random.PRNGKey(0)
    pkey, xkey1, xkey2 = jax.random.split(key, 3)
    w1, b1, w2, b2 = init_params(pkey)

    # 1) small inference batch of CartPole-like 4-dim states
    x_small = jax.random.normal(xkey1, (8, N_IN), jnp.float32)
    out_small = jax.block_until_ready(policy_network_forward(x_small, w1, b1, w2, b2))
    ref_small = _reference(x_small, w1, b1, w2, b2)
    assert out_small.shape == (8, N_OUT)
    assert jnp.allclose(out_small, ref_small, atol=2e-3, rtol=2e-3)
    assert jnp.allclose(jnp.sum(out_small, axis=-1), 1.0, atol=1e-3)

    # 2) larger ragged rollout batch: exercises padding, a multi-step grid
    #    (grid=3) and the in-kernel sublane-chunk loop (S=16 -> 2 chunks)
    x_big = jax.random.normal(xkey2, (4100, N_IN), jnp.float32)
    out_big = jax.block_until_ready(policy_network_forward(x_big, w1, b1, w2, b2))
    ref_big = _reference(x_big, w1, b1, w2, b2)
    assert out_big.shape == (4100, N_OUT)
    assert jnp.allclose(out_big, ref_big, atol=2e-3, rtol=2e-3)
    assert jnp.allclose(jnp.sum(out_big, axis=-1), 1.0, atol=1e-3)

    # 3) single state (1-D input), as used when stepping an env
    x_one = jax.random.normal(key, (N_IN,), jnp.float32)
    out_one = jax.block_until_ready(policy_network_forward(x_one, w1, b1, w2, b2))
    assert out_one.shape == (N_OUT,)
    assert jnp.allclose(out_one, _reference(x_one[None], w1, b1, w2, b2)[0],
                        atol=2e-3, rtol=2e-3)

    print("KERNEL_OK")
</pallas_src>

<mosaic_0001>
module attributes {stable_mosaic.version = 11 : i64} {
  func.func @_policy_kernel(%arg0: i32, %arg1: memref<4x8x128xf32, #tpu.memory_space<vmem>>, %arg2: memref<4x10xf32, #tpu.memory_space<smem>>, %arg3: memref<10xf32, #tpu.memory_space<smem>>, %arg4: memref<10x2xf32, #tpu.memory_space<smem>>, %arg5: memref<2xf32, #tpu.memory_space<smem>>, %arg6: memref<2x8x128xf32, #tpu.memory_space<vmem>>) attributes {dimension_semantics = [#tpu.dimension_semantics<parallel>], iteration_bounds = array<i64: 1>, scalar_prefetch = 0 : i64, scratch_operands = 0 : i64, tpu.core_type = #tpu.core_type<tc>, window_params = [{transform_indices = @transform_0, window_bounds = array<i64: 4, 8, 128>}, {transform_indices = @transform_1, window_bounds = array<i64: 4, 10>}, {transform_indices = @transform_2, window_bounds = array<i64: 10>}, {transform_indices = @transform_3, window_bounds = array<i64: 10, 2>}, {transform_indices = @transform_4, window_bounds = array<i64: 2>}, {transform_indices = @transform_5, window_bounds = array<i64: 2, 8, 128>}]} {
    %c0_i32 = arith.constant 0 : i32
    %c8_i32 = arith.constant 8 : i32
    %0 = arith.muli %c0_i32, %c8_i32 : i32
    %1 = tpu.assume_multiple %0, 8 : i32
    %c0 = arith.constant 0 : index
    %2 = arith.index_cast %1 : i32 to index
    %c0_0 = arith.constant 0 : index
    %3 = vector.load %arg1[%c0, %2, %c0_0] : memref<4x8x128xf32, #tpu.memory_space<vmem>>, vector<1x8x128xf32>
    %4 = vector.shape_cast %3 : vector<1x8x128xf32> to vector<8x128xf32>
    %c1 = arith.constant 1 : index
    %5 = arith.index_cast %1 : i32 to index
    %c0_1 = arith.constant 0 : index
    %6 = vector.load %arg1[%c1, %5, %c0_1] : memref<4x8x128xf32, #tpu.memory_space<vmem>>, vector<1x8x128xf32>
    %7 = vector.shape_cast %6 : vector<1x8x128xf32> to vector<8x128xf32>
    %c2 = arith.constant 2 : index
    %8 = arith.index_cast %1 : i32 to index
    %c0_2 = arith.constant 0 : index
    %9 = vector.load %arg1[%c2, %8, %c0_2] : memref<4x8x128xf32, #tpu.memory_space<vmem>>, vector<1x8x128xf32>
    %10 = vector.shape_cast %9 : vector<1x8x128xf32> to vector<8x128xf32>
    %c3 = arith.constant 3 : index
    %11 = arith.index_cast %1 : i32 to index
    %c0_3 = arith.constant 0 : index
    %12 = vector.load %arg1[%c3, %11, %c0_3] : memref<4x8x128xf32, #tpu.memory_space<vmem>>, vector<1x8x128xf32>
    %13 = vector.shape_cast %12 : vector<1x8x128xf32> to vector<8x128xf32>
    %c0_4 = arith.constant 0 : index
    %14 = memref.load %arg5[%c0_4] : memref<2xf32, #tpu.memory_space<smem>>
    %15 = vector.broadcast %14 : f32 to vector<8x128xf32>
    %c1_5 = arith.constant 1 : index
    %16 = memref.load %arg5[%c1_5] : memref<2xf32, #tpu.memory_space<smem>>
    %17 = vector.broadcast %16 : f32 to vector<8x128xf32>
    %c0_6 = arith.constant 0 : index
    %c0_7 = arith.constant 0 : index
    %18 = memref.load %arg2[%c0_6, %c0_7] : memref<4x10xf32, #tpu.memory_space<smem>>
    %19 = vector.broadcast %18 : f32 to vector<8x128xf32>
    %20 = arith.mulf %4, %19 : vector<8x128xf32>
    %c1_8 = arith.constant 1 : index
    %c0_9 = arith.constant 0 : index
    %21 = memref.load %arg2[%c1_8, %c0_9] : memref<4x10xf32, #tpu.memory_space<smem>>
    %22 = vector.broadcast %21 : f32 to vector<8x128xf32>
    %23 = arith.mulf %7, %22 : vector<8x128xf32>
    %24 = arith.addf %20, %23 : vector<8x128xf32>
    %c2_10 = arith.constant 2 : index
    %c0_11 = arith.constant 0 : index
    %25 = memref.load %arg2[%c2_10, %c0_11] : memref<4x10xf32, #tpu.memory_space<smem>>
    %26 = vector.broadcast %25 : f32 to vector<8x128xf32>
    %27 = arith.mulf %10, %26 : vector<8x128xf32>
    %28 = arith.addf %24, %27 : vector<8x128xf32>
    %c3_12 = arith.constant 3 : index
    %c0_13 = arith.constant 0 : index
    %29 = memref.load %arg2[%c3_12, %c0_13] : memref<4x10xf32, #tpu.memory_space<smem>>
    %30 = vector.broadcast %29 : f32 to vector<8x128xf32>
    %31 = arith.mulf %13, %30 : vector<8x128xf32>
    %32 = arith.addf %28, %31 : vector<8x128xf32>
    %c0_14 = arith.constant 0 : index
    %33 = memref.load %arg3[%c0_14] : memref<10xf32, #tpu.memory_space<smem>>
    %34 = vector.broadcast %33 : f32 to vector<8x128xf32>
    %35 = arith.addf %32, %34 : vector<8x128xf32>
    %cst = arith.constant 0.000000e+00 : f32
    %36 = vector.broadcast %cst : f32 to vector<8x128xf32>
    %37 = arith.maximumf %35, %36 : vector<8x128xf32>
    %c0_15 = arith.constant 0 : index
    %c0_16 = arith.constant 0 : index
    %38 = memref.load %arg4[%c0_15, %c0_16] : memref<10x2xf32, #tpu.memory_space<smem>>
    %39 = vector.broadcast %38 : f32 to vector<8x128xf32>
    %40 = arith.mulf %37, %39 : vector<8x128xf32>
    %41 = arith.addf %15, %40 : vector<8x128xf32>
    %c0_17 = arith.constant 0 : index
    %c1_18 = arith.constant 1 : index
    %42 = memref.load %arg4[%c0_17, %c1_18] : memref<10x2xf32, #tpu.memory_space<smem>>
    %43 = vector.broadcast %42 : f32 to vector<8x128xf32>
    %44 = arith.mulf %37, %43 : vector<8x128xf32>
    %45 = arith.addf %17, %44 : vector<8x128xf32>
    %c0_19 = arith.constant 0 : index
    %c1_20 = arith.constant 1 : index
    %46 = memref.load %arg2[%c0_19, %c1_20] : memref<4x10xf32, #tpu.memory_space<smem>>
    %47 = vector.broadcast %46 : f32 to vector<8x128xf32>
    %48 = arith.mulf %4, %47 : vector<8x128xf32>
    %c1_21 = arith.constant 1 : index
    %c1_22 = arith.constant 1 : index
    %49 = memref.load %arg2[%c1_21, %c1_22] : memref<4x10xf32, #tpu.memory_space<smem>>
    %50 = vector.broadcast %49 : f32 to vector<8x128xf32>
    %51 = arith.mulf %7, %50 : vector<8x128xf32>
    %52 = arith.addf %48, %51 : vector<8x128xf32>
    %c2_23 = arith.constant 2 : index
    %c1_24 = arith.constant 1 : index
    %53 = memref.load %arg2[%c2_23, %c1_24] : memref<4x10xf32, #tpu.memory_space<smem>>
    %54 = vector.broadcast %53 : f32 to vector<8x128xf32>
    %55 = arith.mulf %10, %54 : vector<8x128xf32>
    %56 = arith.addf %52, %55 : vector<8x128xf32>
    %c3_25 = arith.constant 3 : index
    %c1_26 = arith.constant 1 : index
    %57 = memref.load %arg2[%c3_25, %c1_26] : memref<4x10xf32, #tpu.memory_space<smem>>
    %58 = vector.broadcast %57 : f32 to vector<8x128xf32>
    %59 = arith.mulf %13, %58 : vector<8x128xf32>
    %60 = arith.addf %56, %59 : vector<8x128xf32>
    %c1_27 = arith.constant 1 : index
    %61 = memref.load %arg3[%c1_27] : memref<10xf32, #tpu.memory_space<smem>>
    %62 = vector.broadcast %61 : f32 to vector<8x128xf32>
    %63 = arith.addf %60, %62 : vector<8x128xf32>
    %cst_28 = arith.constant 0.000000e+00 : f32
    %64 = vector.broadcast %cst_28 : f32 to vector<8x128xf32>
    %65 = arith.maximumf %63, %64 : vector<8x128xf32>
    %c1_29 = arith.constant 1 : index
    %c0_30 = arith.constant 0 : index
    %66 = memref.load %arg4[%c1_29, %c0_30] : memref<10x2xf32, #tpu.memory_space<smem>>
    %67 = vector.broadcast %66 : f32 to vector<8x128xf32>
    %68 = arith.mulf %65, %67 : vector<8x128xf32>
    %69 = arith.addf %41, %68 : vector<8x128xf32>
    %c1_31 = arith.constant 1 : index
    %c1_32 = arith.constant 1 : index
    %70 = memref.load %arg4[%c1_31, %c1_32] : memref<10x2xf32, #tpu.memory_space<smem>>
    %71 = vector.broadcast %70 : f32 to vector<8x128xf32>
    %72 = arith.mulf %65, %71 : vector<8x128xf32>
    %73 = arith.addf %45, %72 : vector<8x128xf32>
    %c0_33 = arith.constant 0 : index
    %c2_34 = arith.constant 2 : index
    %74 = memref.load %arg2[%c0_33, %c2_34] : memref<4x10xf32, #tpu.memory_space<smem>>
    %75 = vector.broadcast %74 : f32 to vector<8x128xf32>
    %76 = arith.mulf %4, %75 : vector<8x128xf32>
    %c1_35 = arith.constant 1 : index
    %c2_36 = arith.constant 2 : index
    %77 = memref.load %arg2[%c1_35, %c2_36] : memref<4x10xf32, #tpu.memory_space<smem>>
    %78 = vector.broadcast %77 : f32 to vector<8x128xf32>
    %79 = arith.mulf %7, %78 : vector<8x128xf32>
    %80 = arith.addf %76, %79 : vector<8x128xf32>
    %c2_37 = arith.constant 2 : index
    %c2_38 = arith.constant 2 : index
    %81 = memref.load %arg2[%c2_37, %c2_38] : memref<4x10xf32, #tpu.memory_space<smem>>
    %82 = vector.broadcast %81 : f32 to vector<8x128xf32>
    %83 = arith.mulf %10, %82 : vector<8x128xf32>
    %84 = arith.addf %80, %83 : vector<8x128xf32>
    %c3_39 = arith.constant 3 : index
    %c2_40 = arith.constant 2 : index
    %85 = memref.load %arg2[%c3_39, %c2_40] : memref<4x10xf32, #tpu.memory_space<smem>>
    %86 = vector.broadcast %85 : f32 to vector<8x128xf32>
    %87 = arith.mulf %13, %86 : vector<8x128xf32>
    %88 = arith.addf %84, %87 : vector<8x128xf32>
    %c2_41 = arith.constant 2 : index
    %89 = memref.load %arg3[%c2_41] : memref<10xf32, #tpu.memory_space<smem>>
    %90 = vector.broadcast %89 : f32 to vector<8x128xf32>
    %91 = arith.addf %88, %90 : vector<8x128xf32>
    %cst_42 = arith.constant 0.000000e+00 : f32
    %92 = vector.broadcast %cst_42 : f32 to vector<8x128xf32>
    %93 = arith.maximumf %91, %92 : vector<8x128xf32>
    %c2_43 = arith.constant 2 : index
    %c0_44 = arith.constant 0 : index
    %94 = memref.load %arg4[%c2_43, %c0_44] : memref<10x2xf32, #tpu.memory_space<smem>>
    %95 = vector.broadcast %94 : f32 to vector<8x128xf32>
    %96 = arith.mulf %93, %95 : vector<8x128xf32>
    %97 = arith.addf %69, %96 : vector<8x128xf32>
    %c2_45 = arith.constant 2 : index
    %c1_46 = arith.constant 1 : index
    %98 = memref.load %arg4[%c2_45, %c1_46] : memref<10x2xf32, #tpu.memory_space<smem>>
    %99 = vector.broadcast %98 : f32 to vector<8x128xf32>
    %100 = arith.mulf %93, %99 : vector<8x128xf32>
    %101 = arith.addf %73, %100 : vector<8x128xf32>
    %c0_47 = arith.constant 0 : index
    %c3_48 = arith.constant 3 : index
    %102 = memref.load %arg2[%c0_47, %c3_48] : memref<4x10xf32, #tpu.memory_space<smem>>
    %103 = vector.broadcast %102 : f32 to vector<8x128xf32>
    %104 = arith.mulf %4, %103 : vector<8x128xf32>
    %c1_49 = arith.constant 1 : index
    %c3_50 = arith.constant 3 : index
    %105 = memref.load %arg2[%c1_49, %c3_50] : memref<4x10xf32, #tpu.memory_space<smem>>
    %106 = vector.broadcast %105 : f32 to vector<8x128xf32>
    %107 = arith.mulf %7, %106 : vector<8x128xf32>
    %108 = arith.addf %104, %107 : vector<8x128xf32>
    %c2_51 = arith.constant 2 : index
    %c3_52 = arith.constant 3 : index
    %109 = memref.load %arg2[%c2_51, %c3_52] : memref<4x10xf32, #tpu.memory_space<smem>>
    %110 = vector.broadcast %109 : f32 to vector<8x128xf32>
    %111 = arith.mulf %10, %110 : vector<8x128xf32>
    %112 = arith.addf %108, %111 : vector<8x128xf32>
    %c3_53 = arith.constant 3 : index
    %c3_54 = arith.constant 3 : index
    %113 = memref.load %arg2[%c3_53, %c3_54] : memref<4x10xf32, #tpu.memory_space<smem>>
    %114 = vector.broadcast %113 : f32 to vector<8x128xf32>
    %115 = arith.mulf %13, %114 : vector<8x128xf32>
    %116 = arith.addf %112, %115 : vector<8x128xf32>
    %c3_55 = arith.constant 3 : index
    %117 = memref.load %arg3[%c3_55] : memref<10xf32, #tpu.memory_space<smem>>
    %118 = vector.broadcast %117 : f32 to vector<8x128xf32>
    %119 = arith.addf %116, %118 : vector<8x128xf32>
    %cst_56 = arith.constant 0.000000e+00 : f32
    %120 = vector.broadcast %cst_56 : f32 to vector<8x128xf32>
    %121 = arith.maximumf %119, %120 : vector<8x128xf32>
    %c3_57 = arith.constant 3 : index
    %c0_58 = arith.constant 0 : index
    %122 = memref.load %arg4[%c3_57, %c0_58] : memref<10x2xf32, #tpu.memory_space<smem>>
    %123 = vector.broadcast %122 : f32 to vector<8x128xf32>
    %124 = arith.mulf %121, %123 : vector<8x128xf32>
    %125 = arith.addf %97, %124 : vector<8x128xf32>
    %c3_59 = arith.constant 3 : index
    %c1_60 = arith.constant 1 : index
    %126 = memref.load %arg4[%c3_59, %c1_60] : memref<10x2xf32, #tpu.memory_space<smem>>
    %127 = vector.broadcast %126 : f32 to vector<8x128xf32>
    %128 = arith.mulf %121, %127 : vector<8x128xf32>
    %129 = arith.addf %101, %128 : vector<8x128xf32>
    %c0_61 = arith.constant 0 : index
    %c4 = arith.constant 4 : index
    %130 = memref.load %arg2[%c0_61, %c4] : memref<4x10xf32, #tpu.memory_space<smem>>
    %131 = vector.broadcast %130 : f32 to vector<8x128xf32>
    %132 = arith.mulf %4, %131 : vector<8x128xf32>
    %c1_62 = arith.constant 1 : index
    %c4_63 = arith.constant 4 : index
    %133 = memref.load %arg2[%c1_62, %c4_63] : memref<4x10xf32, #tpu.memory_space<smem>>
    %134 = vector.broadcast %133 : f32 to vector<8x128xf32>
    %135 = arith.mulf %7, %134 : vector<8x128xf32>
    %136 = arith.addf %132, %135 : vector<8x128xf32>
    %c2_64 = arith.constant 2 : index
    %c4_65 = arith.constant 4 : index
    %137 = memref.load %arg2[%c2_64, %c4_65] : memref<4x10xf32, #tpu.memory_space<smem>>
    %138 = vector.broadcast %137 : f32 to vector<8x128xf32>
    %139 = arith.mulf %10, %138 : vector<8x128xf32>
    %140 = arith.addf %136, %139 : vector<8x128xf32>
    %c3_66 = arith.constant 3 : index
    %c4_67 = arith.constant 4 : index
    %141 = memref.load %arg2[%c3_66, %c4_67] : memref<4x10xf32, #tpu.memory_space<smem>>
    %142 = vector.broadcast %141 : f32 to vector<8x128xf32>
    %143 = arith.mulf %13, %142 : vector<8x128xf32>
    %144 = arith.addf %140, %143 : vector<8x128xf32>
    %c4_68 = arith.constant 4 : index
    %145 = memref.load %arg3[%c4_68] : memref<10xf32, #tpu.memory_space<smem>>
    %146 = vector.broadcast %145 : f32 to vector<8x128xf32>
    %147 = arith.addf %144, %146 : vector<8x128xf32>
    %cst_69 = arith.constant 0.000000e+00 : f32
    %148 = vector.broadcast %cst_69 : f32 to vector<8x128xf32>
    %149 = arith.maximumf %147, %148 : vector<8x128xf32>
    %c4_70 = arith.constant 4 : index
    %c0_71 = arith.constant 0 : index
    %150 = memref.load %arg4[%c4_70, %c0_71] : memref<10x2xf32, #tpu.memory_space<smem>>
    %151 = vector.broadcast %150 : f32 to vector<8x128xf32>
    %152 = arith.mulf %149, %151 : vector<8x128xf32>
    %153 = arith.addf %125, %152 : vector<8x128xf32>
    %c4_72 = arith.constant 4 : index
    %c1_73 = arith.constant 1 : index
    %154 = memref.load %arg4[%c4_72, %c1_73] : memref<10x2xf32, #tpu.memory_space<smem>>
    %155 = vector.broadcast %154 : f32 to vector<8x128xf32>
    %156 = arith.mulf %149, %155 : vector<8x128xf32>
    %157 = arith.addf %129, %156 : vector<8x128xf32>
    %c0_74 = arith.constant 0 : index
    %c5 = arith.constant 5 : index
    %158 = memref.load %arg2[%c0_74, %c5] : memref<4x10xf32, #tpu.memory_space<smem>>
    %159 = vector.broadcast %158 : f32 to vector<8x128xf32>
    %160 = arith.mulf %4, %159 : vector<8x128xf32>
    %c1_75 = arith.constant 1 : index
    %c5_76 = arith.constant 5 : index
    %161 = memref.load %arg2[%c1_75, %c5_76] : memref<4x10xf32, #tpu.memory_space<smem>>
    %162 = vector.broadcast %161 : f32 to vector<8x128xf32>
    %163 = arith.mulf %7, %162 : vector<8x128xf32>
    %164 = arith.addf %160, %163 : vector<8x128xf32>
    %c2_77 = arith.constant 2 : index
    %c5_78 = arith.constant 5 : index
    %165 = memref.load %arg2[%c2_77, %c5_78] : memref<4x10xf32, #tpu.memory_space<smem>>
    %166 = vector.broadcast %165 : f32 to vector<8x128xf32>
    %167 = arith.mulf %10, %166 : vector<8x128xf32>
    %168 = arith.addf %164, %167 : vector<8x128xf32>
    %c3_79 = arith.constant 3 : index
    %c5_80 = arith.constant 5 : index
    %169 = memref.load %arg2[%c3_79, %c5_80] : memref<4x10xf32, #tpu.memory_space<smem>>
    %170 = vector.broadcast %169 : f32 to vector<8x128xf32>
    %171 = arith.mulf %13, %170 : vector<8x128xf32>
    %172 = arith.addf %168, %171 : vector<8x128xf32>
    %c5_81 = arith.constant 5 : index
    %173 = memref.load %arg3[%c5_81] : memref<10xf32, #tpu.memory_space<smem>>
    %174 = vector.broadcast %173 : f32 to vector<8x128xf32>
    %175 = arith.addf %172, %174 : vector<8x128xf32>
    %cst_82 = arith.constant 0.000000e+00 : f32
    %176 = vector.broadcast %cst_82 : f32 to vector<8x128xf32>
    %177 = arith.maximumf %175, %176 : vector<8x128xf32>
    %c5_83 = arith.constant 5 : index
    %c0_84 = arith.constant 0 : index
    %178 = memref.load %arg4[%c5_83, %c0_84] : memref<10x2xf32, #tpu.memory_space<smem>>
    %179 = vector.broadcast %178 : f32 to vector<8x128xf32>
    %180 = arith.mulf %177, %179 : vector<8x128xf32>
    %181 = arith.addf %153, %180 : vector<8x128xf32>
    %c5_85 = arith.constant 5 : index
    %c1_86 = arith.constant 1 : index
    %182 = memref.load %arg4[%c5_85, %c1_86] : memref<10x2xf32, #tpu.memory_space<smem>>
    %183 = vector.broadcast %182 : f32 to vector<8x128xf32>
    %184 = arith.mulf %177, %183 : vector<8x128xf32>
    %185 = arith.addf %157, %184 : vector<8x128xf32>
    %c0_87 = arith.constant 0 : index
    %c6 = arith.constant 6 : index
    %186 = memref.load %arg2[%c0_87, %c6] : memref<4x10xf32, #tpu.memory_space<smem>>
    %187 = vector.broadcast %186 : f32 to vector<8x128xf32>
    %188 = arith.mulf %4, %187 : vector<8x128xf32>
    %c1_88 = arith.constant 1 : index
    %c6_89 = arith.constant 6 : index
    %189 = memref.load %arg2[%c1_88, %c6_89] : memref<4x10xf32, #tpu.memory_space<smem>>
    %190 = vector.broadcast %189 : f32 to vector<8x128xf32>
    %191 = arith.mulf %7, %190 : vector<8x128xf32>
    %192 = arith.addf %188, %191 : vector<8x128xf32>
    %c2_90 = arith.constant 2 : index
    %c6_91 = arith.constant 6 : index
    %193 = memref.load %arg2[%c2_90, %c6_91] : memref<4x10xf32, #tpu.memory_space<smem>>
    %194 = vector.broadcast %193 : f32 to vector<8x128xf32>
    %195 = arith.mulf %10, %194 : vector<8x128xf32>
    %196 = arith.addf %192, %195 : vector<8x128xf32>
    %c3_92 = arith.constant 3 : index
    %c6_93 = arith.constant 6 : index
    %197 = memref.load %arg2[%c3_92, %c6_93] : memref<4x10xf32, #tpu.memory_space<smem>>
    %198 = vector.broadcast %197 : f32 to vector<8x128xf32>
    %199 = arith.mulf %13, %198 : vector<8x128xf32>
    %200 = arith.addf %196, %199 : vector<8x128xf32>
    %c6_94 = arith.constant 6 : index
    %201 = memref.load %arg3[%c6_94] : memref<10xf32, #tpu.memory_space<smem>>
    %202 = vector.broadcast %201 : f32 to vector<8x128xf32>
    %203 = arith.addf %200, %202 : vector<8x128xf32>
    %cst_95 = arith.constant 0.000000e+00 : f32
    %204 = vector.broadcast %cst_95 : f32 to vector<8x128xf32>
    %205 = arith.maximumf %203, %204 : vector<8x128xf32>
    %c6_96 = arith.constant 6 : index
    %c0_97 = arith.constant 0 : index
    %206 = memref.load %arg4[%c6_96, %c0_97] : memref<10x2xf32, #tpu.memory_space<smem>>
    %207 = vector.broadcast %206 : f32 to vector<8x128xf32>
    %208 = arith.mulf %205, %207 : vector<8x128xf32>
    %209 = arith.addf %181, %208 : vector<8x128xf32>
    %c6_98 = arith.constant 6 : index
    %c1_99 = arith.constant 1 : index
    %210 = memref.load %arg4[%c6_98, %c1_99] : memref<10x2xf32, #tpu.memory_space<smem>>
    %211 = vector.broadcast %210 : f32 to vector<8x128xf32>
    %212 = arith.mulf %205, %211 : vector<8x128xf32>
    %213 = arith.addf %185, %212 : vector<8x128xf32>
    %c0_100 = arith.constant 0 : index
    %c7 = arith.constant 7 : index
    %214 = memref.load %arg2[%c0_100, %c7] : memref<4x10xf32, #tpu.memory_space<smem>>
    %215 = vector.broadcast %214 : f32 to vector<8x128xf32>
    %216 = arith.mulf %4, %215 : vector<8x128xf32>
    %c1_101 = arith.constant 1 : index
    %c7_102 = arith.constant 7 : index
    %217 = memref.load %arg2[%c1_101, %c7_102] : memref<4x10xf32, #tpu.memory_space<smem>>
    %218 = vector.broadcast %217 : f32 to vector<8x128xf32>
    %219 = arith.mulf %7, %218 : vector<8x128xf32>
    %220 = arith.addf %216, %219 : vector<8x128xf32>
    %c2_103 = arith.constant 2 : index
    %c7_104 = arith.constant 7 : index
    %221 = memref.load %arg2[%c2_103, %c7_104] : memref<4x10xf32, #tpu.memory_space<smem>>
    %222 = vector.broadcast %221 : f32 to vector<8x128xf32>
    %223 = arith.mulf %10, %222 : vector<8x128xf32>
    %224 = arith.addf %220, %223 : vector<8x128xf32>
    %c3_105 = arith.constant 3 : index
    %c7_106 = arith.constant 7 : index
    %225 = memref.load %arg2[%c3_105, %c7_106] : memref<4x10xf32, #tpu.memory_space<smem>>
    %226 = vector.broadcast %225 : f32 to vector<8x128xf32>
    %227 = arith.mulf %13, %226 : vector<8x128xf32>
    %228 = arith.addf %224, %227 : vector<8x128xf32>
    %c7_107 = arith.constant 7 : index
    %229 = memref.load %arg3[%c7_107] : memref<10xf32, #tpu.memory_space<smem>>
    %230 = vector.broadcast %229 : f32 to vector<8x128xf32>
    %231 = arith.addf %228, %230 : vector<8x128xf32>
    %cst_108 = arith.constant 0.000000e+00 : f32
    %232 = vector.broadcast %cst_108 : f32 to vector<8x128xf32>
    %233 = arith.maximumf %231, %232 : vector<8x128xf32>
    %c7_109 = arith.constant 7 : index
    %c0_110 = arith.constant 0 : index
    %234 = memref.load %arg4[%c7_109, %c0_110] : memref<10x2xf32, #tpu.memory_space<smem>>
    %235 = vector.broadcast %234 : f32 to vector<8x128xf32>
    %236 = arith.mulf %233, %235 : vector<8x128xf32>
    %237 = arith.addf %209, %236 : vector<8x128xf32>
    %c7_111 = arith.constant 7 : index
    %c1_112 = arith.constant 1 : index
    %238 = memref.load %arg4[%c7_111, %c1_112] : memref<10x2xf32, #tpu.memory_space<smem>>
    %239 = vector.broadcast %238 : f32 to vector<8x128xf32>
    %240 = arith.mulf %233, %239 : vector<8x128xf32>
    %241 = arith.addf %213, %240 : vector<8x128xf32>
    %c0_113 = arith.constant 0 : index
    %c8 = arith.constant 8 : index
    %242 = memref.load %arg2[%c0_113, %c8] : memref<4x10xf32, #tpu.memory_space<smem>>
    %243 = vector.broadcast %242 : f32 to vector<8x128xf32>
    %244 = arith.mulf %4, %243 : vector<8x128xf32>
    %c1_114 = arith.constant 1 : index
    %c8_115 = arith.constant 8 : index
    %245 = memref.load %arg2[%c1_114, %c8_115] : memref<4x10xf32, #tpu.memory_space<smem>>
    %246 = vector.broadcast %245 : f32 to vector<8x128xf32>
    %247 = arith.mulf %7, %246 : vector<8x128xf32>
    %248 = arith.addf %244, %247 : vector<8x128xf32>
    %c2_116 = arith.constant 2 : index
    %c8_117 = arith.constant 8 : index
    %249 = memref.load %arg2[%c2_116, %c8_117] : memref<4x10xf32, #tpu.memory_space<smem>>
    %250 = vector.broadcast %249 : f32 to vector<8x128xf32>
    %251 = arith.mulf %10, %250 : vector<8x128xf32>
    %252 = arith.addf %248, %251 : vector<8x128xf32>
    %c3_118 = arith.constant 3 : index
    %c8_119 = arith.constant 8 : index
    %253 = memref.load %arg2[%c3_118, %c8_119] : memref<4x10xf32, #tpu.memory_space<smem>>
    %254 = vector.broadcast %253 : f32 to vector<8x128xf32>
    %255 = arith.mulf %13, %254 : vector<8x128xf32>
    %256 = arith.addf %252, %255 : vector<8x128xf32>
    %c8_120 = arith.constant 8 : index
    %257 = memref.load %arg3[%c8_120] : memref<10xf32, #tpu.memory_space<smem>>
    %258 = vector.broadcast %257 : f32 to vector<8x128xf32>
    %259 = arith.addf %256, %258 : vector<8x128xf32>
    %cst_121 = arith.constant 0.000000e+00 : f32
    %260 = vector.broadcast %cst_121 : f32 to vector<8x128xf32>
    %261 = arith.maximumf %259, %260 : vector<8x128xf32>
    %c8_122 = arith.constant 8 : index
    %c0_123 = arith.constant 0 : index
    %262 = memref.load %arg4[%c8_122, %c0_123] : memref<10x2xf32, #tpu.memory_space<smem>>
    %263 = vector.broadcast %262 : f32 to vector<8x128xf32>
    %264 = arith.mulf %261, %263 : vector<8x128xf32>
    %265 = arith.addf %237, %264 : vector<8x128xf32>
    %c8_124 = arith.constant 8 : index
    %c1_125 = arith.constant 1 : index
    %266 = memref.load %arg4[%c8_124, %c1_125] : memref<10x2xf32, #tpu.memory_space<smem>>
    %267 = vector.broadcast %266 : f32 to vector<8x128xf32>
    %268 = arith.mulf %261, %267 : vector<8x128xf32>
    %269 = arith.addf %241, %268 : vector<8x128xf32>
    %c0_126 = arith.constant 0 : index
    %c9 = arith.constant 9 : index
    %270 = memref.load %arg2[%c0_126, %c9] : memref<4x10xf32, #tpu.memory_space<smem>>
    %271 = vector.broadcast %270 : f32 to vector<8x128xf32>
    %272 = arith.mulf %4, %271 : vector<8x128xf32>
    %c1_127 = arith.constant 1 : index
    %c9_128 = arith.constant 9 : index
    %273 = memref.load %arg2[%c1_127, %c9_128] : memref<4x10xf32, #tpu.memory_space<smem>>
    %274 = vector.broadcast %273 : f32 to vector<8x128xf32>
    %275 = arith.mulf %7, %274 : vector<8x128xf32>
    %276 = arith.addf %272, %275 : vector<8x128xf32>
    %c2_129 = arith.constant 2 : index
    %c9_130 = arith.constant 9 : index
    %277 = memref.load %arg2[%c2_129, %c9_130] : memref<4x10xf32, #tpu.memory_space<smem>>
    %278 = vector.broadcast %277 : f32 to vector<8x128xf32>
    %279 = arith.mulf %10, %278 : vector<8x128xf32>
    %280 = arith.addf %276, %279 : vector<8x128xf32>
    %c3_131 = arith.constant 3 : index
    %c9_132 = arith.constant 9 : index
    %281 = memref.load %arg2[%c3_131, %c9_132] : memref<4x10xf32, #tpu.memory_space<smem>>
    %282 = vector.broadcast %281 : f32 to vector<8x128xf32>
    %283 = arith.mulf %13, %282 : vector<8x128xf32>
    %284 = arith.addf %280, %283 : vector<8x128xf32>
    %c9_133 = arith.constant 9 : index
    %285 = memref.load %arg3[%c9_133] : memref<10xf32, #tpu.memory_space<smem>>
    %286 = vector.broadcast %285 : f32 to vector<8x128xf32>
    %287 = arith.addf %284, %286 : vector<8x128xf32>
    %cst_134 = arith.constant 0.000000e+00 : f32
    %288 = vector.broadcast %cst_134 : f32 to vector<8x128xf32>
    %289 = arith.maximumf %287, %288 : vector<8x128xf32>
    %c9_135 = arith.constant 9 : index
    %c0_136 = arith.constant 0 : index
    %290 = memref.load %arg4[%c9_135, %c0_136] : memref<10x2xf32, #tpu.memory_space<smem>>
    %291 = vector.broadcast %290 : f32 to vector<8x128xf32>
    %292 = arith.mulf %289, %291 : vector<8x128xf32>
    %293 = arith.addf %265, %292 : vector<8x128xf32>
    %c9_137 = arith.constant 9 : index
    %c1_138 = arith.constant 1 : index
    %294 = memref.load %arg4[%c9_137, %c1_138] : memref<10x2xf32, #tpu.memory_space<smem>>
    %295 = vector.broadcast %294 : f32 to vector<8x128xf32>
    %296 = arith.mulf %289, %295 : vector<8x128xf32>
    %297 = arith.addf %269, %296 : vector<8x128xf32>
    %298 = arith.subf %297, %293 : vector<8x128xf32>
    %299 = math.exp %298 : vector<8x128xf32>
    %cst_139 = arith.constant 1.000000e+00 : f32
    %300 = vector.broadcast %cst_139 : f32 to vector<8x128xf32>
    %301 = arith.addf %300, %299 : vector<8x128xf32>
    %cst_140 = arith.constant 1.000000e+00 : f32
    %302 = vector.broadcast %cst_140 : f32 to vector<8x128xf32>
    %303 = arith.divf %302, %301 : vector<8x128xf32>
    %c0_141 = arith.constant 0 : index
    %304 = arith.index_cast %1 : i32 to index
    %c0_142 = arith.constant 0 : index
    %305 = vector.load %arg6[%c0_141, %304, %c0_142] : memref<2x8x128xf32, #tpu.memory_space<vmem>>, vector<1x8x128xf32>
    %306 = vector.shape_cast %305 : vector<1x8x128xf32> to vector<8x128xf32>
    %307 = vector.shape_cast %303 : vector<8x128xf32> to vector<1x8x128xf32>
    tpu.vector_store %arg6[%c0_141, %304, %c0_142], %307 {strides = array<i32>} : memref<2x8x128xf32, #tpu.memory_space<vmem>>, vector<1x8x128xf32>,
    %cst_143 = arith.constant 1.000000e+00 : f32
    %308 = vector.broadcast %cst_143 : f32 to vector<8x128xf32>
    %309 = arith.subf %308, %303 : vector<8x128xf32>
    %c1_144 = arith.constant 1 : index
    %310 = arith.index_cast %1 : i32 to index
    %c0_145 = arith.constant 0 : index
    %311 = vector.load %arg6[%c1_144, %310, %c0_145] : memref<2x8x128xf32, #tpu.memory_space<vmem>>, vector<1x8x128xf32>
    %312 = vector.shape_cast %311 : vector<1x8x128xf32> to vector<8x128xf32>
    %313 = vector.shape_cast %309 : vector<8x128xf32> to vector<1x8x128xf32>
    tpu.vector_store %arg6[%c1_144, %310, %c0_145], %313 {strides = array<i32>} : memref<2x8x128xf32, #tpu.memory_space<vmem>>, vector<1x8x128xf32>,
    %c1_i32 = arith.constant 1 : i32
    return
  }
  func.func @transform_0(%arg0: i32) -> (i32, i32, i32) {
    %c0_i32 = arith.constant 0 : i32
    %c0_i32_0 = arith.constant 0 : i32
    %c0_i32_1 = arith.constant 0 : i32
    return %c0_i32, %arg0, %c0_i32_0 : i32, i32, i32
  }
  func.func @transform_1(%arg0: i32) -> (i32, i32) {
    %c0_i32 = arith.constant 0 : i32
    %c0_i32_0 = arith.constant 0 : i32
    %c0_i32_1 = arith.constant 0 : i32
    return %c0_i32, %c0_i32_0 : i32, i32
  }
  func.func @transform_2(%arg0: i32) -> i32 {
    %c0_i32 = arith.constant 0 : i32
    %c0_i32_0 = arith.constant 0 : i32
    return %c0_i32 : i32
  }
  func.func @transform_3(%arg0: i32) -> (i32, i32) {
    %c0_i32 = arith.constant 0 : i32
    %c0_i32_0 = arith.constant 0 : i32
    %c0_i32_1 = arith.constant 0 : i32
    return %c0_i32, %c0_i32_0 : i32, i32
  }
  func.func @transform_4(%arg0: i32) -> i32 {
    %c0_i32 = arith.constant 0 : i32
    %c0_i32_0 = arith.constant 0 : i32
    return %c0_i32 : i32
  }
  func.func @transform_5(%arg0: i32) -> (i32, i32, i32) {
    %c0_i32 = arith.constant 0 : i32
    %c0_i32_0 = arith.constant 0 : i32
    %c0_i32_1 = arith.constant 0 : i32
    return %c0_i32, %arg0, %c0_i32_0 : i32, i32, i32
  }
}

</mosaic_0001>

<bundles_post_ra>
// kernel: tpu_custom_call.1
= control target key start
LH: loop header
LB: loop body
LE: loop exit
PB: predicated region body
PF: predicated region fallthrough
CT: control target
= control target key end

     0   :  { %10 = vsyncpa [#allocation3], 0  ;;  %s912_s0 = inlined_call_operand.hbm [shape: f32[4,8,128], index: 0, kind: input, shape index: {}]   ;;  %s913_s1 = inlined_call_operand.vmem [shape: f32[4,10], index: 1, kind: input, shape index: {}]   ;;  %s914_s2 = inlined_call_operand.vmem [shape: f32[10], index: 2, kind: input, shape index: {}]   ;;  %s915_s3 = inlined_call_operand.vmem [shape: f32[10,2], index: 3, kind: input, shape index: {}]   ;;  %s916_s4 = inlined_call_operand.vmem [shape: f32[2], index: 4, kind: input, shape index: {}]   ;;  %s917_s5 = inlined_call_operand.hbm [shape: f32[2,8,128], index: 5, kind: output, shape index: {}]  }
   0x1   :  { %11 = vsyncpa [#allocation5], 0 }
   0x2   :  { %12 = vsyncpa [#allocation8], 0 }
   0x3   :  { %13 = vsyncpa [#allocation11], 0  ;;  %s43_s20 = sshll.u32 %s914_s2, 4  ;;  %s44_s20 = int_to_ptr.vmem [resolvable:$true] %s43_s20 }
   0x4   :  { %14 = vsyncpa [#allocation4], 0  ;;  %s483_s21 = scalar_lea.vmem %s44_s20, 16  ;;  %p488_p1 = scmp.lt.s32.totalorder %s44_s20, %s44_s20 }
   0x5   :  { %p484_p0 = scmp.ne.s32.totalorder %s44_s20, %s483_s21  ;;  %p489_p2 = scmp.lt.s32.totalorder %s483_s21, %s483_s21 }
   0x7   :  { %p490_p3 = por %p489_p2, %p488_p1 }
   0x9   :  { %p491_p4 = pnand %p490_p3, %p484_p0 }
   0xb   :  { %494 = shalt.err (!%p491_p4)
}
   0xc   :  { %s585_s22 = smov [#allocation7]   ;;  %s586_s23 = smov [#allocation2]  }
   0xd   :  { %46 = dma.vmem_to_smem %s44_s20, 16, %s585_s22, [#allocation8]  }
   0xe   :  { %s20_s24 = sshll.u32 %s586_s23, 4  ;;  %s495_s27 = scalar_lea.hbm %s912_s0, 512  ;;  %s21_s24 = int_to_ptr.vmem [resolvable:$true] %s20_s24 }
   0xf   :  { %p496_p5 = scmp.ne.s32.totalorder %s912_s0, %s495_s27  ;;  %p499_p6 = scmp.lt.u32.totalorder %s495_s27, %s912_s0 }
  0x11   :  { %p501_p7 = pnand %p499_p6, %p496_p5 }
  0x13   :  { %504 = shalt.err (!%p501_p7)
}
  0x14   :  { %s505_s6 = scalar_lea.vmem %s21_s24, 512  ;;  %p510_p9 = scmp.lt.s32.totalorder %s21_s24, %s21_s24 }
  0x15   :  { %p506_p8 = scmp.ne.s32.totalorder %s21_s24, %s505_s6  ;;  %p511_p10 = scmp.lt.s32.totalorder %s505_s6, %s505_s6 }
  0x17   :  { %p512_p11 = por %p511_p10, %p510_p9 }
  0x19   :  { %p513_p12 = pnand %p512_p11, %p506_p8 }
  0x1b   :  { %516 = shalt.err (!%p513_p12)
}
  0x1c   :  { %s587_s7 = smov 128   ;;  %s588_s8 = smov 8  }
  0x1d   :  { %26 = dma.hbm_to_vmem [thread:$0]  %s912_s0, 512, %s21_s24, [#allocation3], %s587_s7, %s587_s7, %s588_s8  }
  0x1e   :  { %s33_s13 = sshll.u32 %s913_s1, 4  ;;  %s52_s16 = sshll.u32 %s915_s3, 4  ;;  %s34_s13 = int_to_ptr.vmem [resolvable:$true] %s33_s13  ;;  %s53_s16 = int_to_ptr.vmem [resolvable:$true] %s52_s16 }
  0x1f   :  { %s517_s17 = scalar_lea.vmem %s34_s13, 64  ;;  %p522_p0 = scmp.lt.s32.totalorder %s34_s13, %s34_s13 }
  0x20   :  { %p518_p13 = scmp.ne.s32.totalorder %s34_s13, %s517_s17  ;;  %p523_p1 = scmp.lt.s32.totalorder %s517_s17, %s517_s17 }
  0x22   :  { %p524_p2 = por %p523_p1, %p522_p0 }
  0x24   :  { %p525_p3 = pnand %p524_p2, %p518_p13 }
  0x26   :  { %528 = shalt.err (!%p525_p3)
}
  0x27   :  { %s589_s18 = smov [#allocation6]   ;;  %s529_s0 = scalar_lea.vmem %s53_s16, 256 }
  0x28   :  { %36 = dma.vmem_to_smem %s34_s13, 64, %s589_s18, [#allocation5]  }
  0x29   :  { %p530_p4 = scmp.ne.s32.totalorder %s53_s16, %s529_s0  ;;  %p534_p5 = scmp.lt.s32.totalorder %s53_s16, %s53_s16 }
  0x2a   :  { %p535_p6 = scmp.lt.s32.totalorder %s529_s0, %s529_s0 }
  0x2c   :  { %p536_p7 = por %p535_p6, %p534_p5 }
  0x2e   :  { %p537_p8 = pnand %p536_p7, %p530_p4 }
  0x30   :  { %540 = shalt.err (!%p537_p8)
}
  0x31   :  { %s590_s1 = smov [#allocation9]   ;;  %s65_s20 = sshll.u32 %s916_s4, 4  ;;  %s66_s20 = int_to_ptr.vmem [resolvable:$true] %s65_s20 }
  0x32   :  { %58 = dma.vmem_to_smem %s53_s16, 256, %s590_s1, [#allocation8], %s587_s7, %s587_s7, %s588_s8  }
  0x33   :  { %s541_s21 = scalar_lea.vmem %s66_s20, 16  ;;  %p546_p10 = scmp.lt.s32.totalorder %s66_s20, %s66_s20 }
  0x34   :  { %p542_p9 = scmp.ne.s32.totalorder %s66_s20, %s541_s21  ;;  %p547_p11 = scmp.lt.s32.totalorder %s541_s21, %s541_s21 }
  0x36   :  { %p548_p12 = por %p547_p11, %p546_p10 }
  0x38   :  { %p549_p13 = pnand %p548_p12, %p542_p9 }
  0x3a   :  { %552 = shalt.err (!%p549_p13)
}
  0x3b   :  { %s591_s22 = smov [#allocation10]  }
  0x3c   :  { %68 = dma.vmem_to_smem %s66_s20, 16, %s591_s22, [#allocation11]  }
  0x3d   :  { %575 = dma.done.wait [#allocation3], 512  }
  0x3e   :  { %576 = vsyncadd [#allocation3], 4294966784 }
  0x3f   :  { %577 = dma.done.wait [#allocation5], 64  }
  0x40   :  { %578 = vsyncadd [#allocation5], 4294967232 }
  0x41   :  { %579 = dma.done.wait [#allocation8], 272  }
  0x42   :  { %580 = vsyncadd [#allocation8], 4294967024 }
  0x43   :  { %581 = dma.done.wait [#allocation11], 16  }
  0x44   :  { %582 = vsyncadd [#allocation11], 4294967280 }
  0x45   :  { %84 = sfence }
  0x46   :  { %s653_s4 = sld [smem:[#allocation10]]  ;;  %s655_s23 = sld [smem:[#allocation10 + $0x1]]  ;;  %v663_v0 = vld [vmem:[#allocation2] sm:$0xff]  ;;  %v665_v1 = vld [vmem:[#allocation2 + $0x8] sm:$0xff]  ;;  %v667_v2 = vld [vmem:[#allocation2 + $0x10] sm:$0xff] }
  0x47   :  { %s99_s24 = sld [smem:[#allocation6]]  ;;  %s661_s29 = sld [smem:[#allocation9 + $0x1]]  ;;  %v677_v4 = vld [vmem:[#allocation2 + $0x18] sm:$0xff] }
  0x48   :  { %s404_s25 = sld [smem:[#allocation6 + $0x80]]  ;;  %s408_s30 = sld [smem:[#allocation6 + $0x1]] }
  0x49   :  { %s405_s26 = sld [smem:[#allocation6 + $0x100]]  ;;  %s409_s6 = sld [smem:[#allocation6 + $0x81]] }
  0x4a   :  { %s406_s27 = sld [smem:[#allocation6 + $0x180]]  ;;  %s669_s9 = sld [smem:[#allocation6 + $0x101]] }
  0x4b   :  { %s657_s28 = sld [smem:[#allocation7]]  ;;  %s671_s10 = sld [smem:[#allocation6 + $0x181]] }
  0x4c   :  { %s659_s2 = sld [smem:[#allocation9]]  ;;  %s673_s11 = sld [smem:[#allocation7 + $0x1]]  ;;  %v96_v11 = vstv %s653_s4  ;;  %v98_v12 = vstv %s655_s23 }
  0x4d   :  { %v100_v3 = vstv %s99_s24  ;;  %s675_s12 = sld [smem:[#allocation9 + $0x80]]  ;;  %s680_s13 = sld [smem:[#allocation9 + $0x81]]  ;;  %v123_v25 = vstv %s661_s29 }
  0x4e   :  { %v101_v5 = vmul.f32 %v100_v3, %v663_v0  ;;  %v103_v6 = vstv %s404_s25  ;;  %s682_s14 = sld [smem:[#allocation6 + $0x2]]  ;;  %v127_v15 = vstv %s408_s30  ;;  %s701_s0 = sld [smem:[#allocation6 + $0x3]] }
  0x4f   :  { %v107_v7 = vstv %s405_s26  ;;  %v104_v8 = vmul.f32 %v103_v6, %v665_v1  ;;  %s686_s15 = sld [smem:[#allocation6 + $0x82]]  ;;  %v130_v16 = vstv %s409_s6  ;;  %v128_v17 = vmul.f32 %v127_v15, %v663_v0  ;;  %s703_s1 = sld [smem:[#allocation6 + $0x83]] }
  0x50   :  { %v108_v9 = vmul.f32 %v107_v7, %v667_v2  ;;  %v111_v10 = vstv %s406_s27  ;;  %s688_s16 = sld [smem:[#allocation6 + $0x102]]  ;;  %v131_v18 = vmul.f32 %v130_v16, %v665_v1  ;;  %v134_v19 = vstv %s669_s9  ;;  %s708_s3 = sld [smem:[#allocation6 + $0x103]] }
  0x51   :  { %s692_s17 = sld [smem:[#allocation6 + $0x182]]  ;;  %v105_v13 = vadd.f32 %v104_v8, %v101_v5  ;;  %v112_v14 = vmul.f32 %v111_v10, %v677_v4  ;;  %v138_v20 = vstv %s671_s10  ;;  %v115_v22 = vstv %s657_s28  ;;  %s710_s19 = sld [smem:[#allocation6 + $0x183]] }
  0x52   :  { %s695_s18 = sld [smem:[#allocation7 + $0x2]]  ;;  %v119_v23 = vstv %s659_s2  ;;  %v135_v24 = vmul.f32 %v134_v19, %v667_v2  ;;  %v132_v26 = vadd.f32 %v131_v18, %v128_v17  ;;  %v139_v27 = vmul.f32 %v138_v20, %v677_v4  ;;  %s718_s20 = sld [smem:[#allocation7 + $0x3]] }
  0x53   :  { %v109_v21 = vadd.f32 %v108_v9, %v105_v13  ;;  %s723_s21 = sld [smem:[#allocation6 + $0x4]]  ;;  %v142_v38 = vstv %s673_s11  ;;  %v146_v39 = vstv %s675_s12  ;;  %v150_v40 = vstv %s680_s13  ;;  %s735_s26 = sld [smem:[#allocation9 + $0x100]] }
  0x54   :  { %v154_v28 = vstv %s682_s14  ;;  %v136_v33 = vadd.f32 %v135_v24, %v132_v26  ;;  %s725_s22 = sld [smem:[#allocation6 + $0x84]]  ;;  %s737_s27 = sld [smem:[#allocation9 + $0x101]]  ;;  %v181_v44 = vstv %s701_s0 }
  0x55   :  { %v113_v29 = vadd.f32 %v112_v14, %v109_v21  ;;  %v155_v30 = vmul.f32 %v154_v28, %v663_v0  ;;  %v157_v31 = vstv %s686_s15  ;;  %s730_s24 = sld [smem:[#allocation6 + $0x104]]  ;;  %v182_v46 = vmul.f32 %v181_v44, %v663_v0  ;;  %s743_s28 = sld [smem:[#allocation9 + $0x180]] }
  0x56   :  { %v161_v32 = vstv %s688_s16  ;;  %v158_v34 = vmul.f32 %v157_v31, %v665_v1  ;;  %s732_s25 = sld [smem:[#allocation6 + $0x184]]  ;;  %v140_v41 = vadd.f32 %v139_v27, %v136_v33  ;;  %v184_v47 = vstv %s703_s1  ;;  %s749_s2 = sld [smem:[#allocation9 + $0x181]] }
  0x57   :  { %v162_v35 = vmul.f32 %v161_v32, %v667_v2  ;;  %v165_v36 = vstv %s692_s17  ;;  %v116_v37 = vadd.f32 %v115_v22, %v113_v29  ;;  %v188_v48 = vstv %s708_s3  ;;  %s751_s29 = sld [smem:[#allocation6 + $0x5]]  ;;  %s754_s30 = sld [smem:[#allocation7 + $0x4]] }
  0x58   :  { %v159_v42 = vadd.f32 %v158_v34, %v155_v30  ;;  %v166_v43 = vmul.f32 %v165_v36, %v677_v4  ;;  %v143_v49 = vadd.f32 %v142_v38, %v140_v41  ;;  %v185_v51 = vmul.f32 %v184_v47, %v665_v1  ;;  %s756_s6 = sld [smem:[#allocation6 + $0x85]]  ;;  %s767_s11 = sld [smem:[#allocation9 + $0x200]] }
  0x59   :  { %v117_v45 = vmax.f32 %v116_v37, 0.0  ;;  %v189_v52 = vmul.f32 %v188_v48, %v667_v2  ;;  %v169_v55 = vstv %s695_s18  ;;  %v192_v56 = vstv %s710_s19  ;;  %s763_s9 = sld [smem:[#allocation6 + $0x105]]  ;;  %s769_s12 = sld [smem:[#allocation9 + $0x201]] }
  0x5a   :  { %v163_v50 = vadd.f32 %v162_v35, %v159_v42  ;;  %v144_v57 = vmax.f32 %v143_v49, 0.0  ;;  %v186_v59 = vadd.f32 %v185_v51, %v182_v46  ;;  %v193_v60 = vmul.f32 %v192_v56, %v677_v4  ;;  %s765_s10 = sld [smem:[#allocation6 + $0x185]]  ;;  %s779_s23 = sld [smem:[#allocation6 + $0x6]] }
  0x5b   :  { %v120_v53 = vmul.f32 %v119_v23, %v117_v45  ;;  %v124_v54 = vmul.f32 %v123_v25, %v117_v45  ;;  %v196_v63 = vstv %s718_s20  ;;  %v208_v8 = vstv %s723_s21  ;;  %s777_s4 = sld [smem:[#allocation7 + $0x5]]  ;;  %s785_s13 = sld [smem:[#allocation6 + $0x86]] }
  0x5c   :  { %v167_v58 = vadd.f32 %v166_v43, %v163_v50  ;;  %v147_v3 = vmul.f32 %v146_v39, %v144_v57  ;;  %v151_v5 = vmul.f32 %v150_v40, %v144_v57  ;;  %v190_v7 = vadd.f32 %v189_v52, %v186_v59  ;;  %s787_s14 = sld [smem:[#allocation6 + $0x106]]  ;;  %s791_s15 = sld [smem:[#allocation9 + $0x280]] }
  0x5d   :  { %v121_v61 = vadd.f32 %v120_v53, %v96_v11  ;;  %v125_v62 = vadd.f32 %v124_v54, %v98_v12  ;;  %v211_v9 = vstv %s725_s22  ;;  %v215_v10 = vstv %s730_s24  ;;  %s793_s16 = sld [smem:[#allocation6 + $0x186]]  ;;  %s801_s17 = sld [smem:[#allocation6 + $0x7]] }
  0x5e   :  { %v170_v6 = vadd.f32 %v169_v55, %v167_v58  ;;  %v219_v11 = vstv %s732_s25  ;;  %v173_v13 = vstv %s735_s26  ;;  %v177_v14 = vstv %s737_s27  ;;  %s803_s18 = sld [smem:[#allocation6 + $0x87]]  ;;  %s809_s0 = sld [smem:[#allocation9 + $0x281]] }
  0x5f   :  { %v194_v15 = vadd.f32 %v193_v60, %v190_v7  ;;  %v200_v16 = vstv %s743_s28  ;;  %v209_v17 = vmul.f32 %v208_v8, %v663_v0  ;;  %v212_v18 = vmul.f32 %v211_v9, %v665_v1  ;;  %s811_s1 = sld [smem:[#allocation7 + $0x6]]  ;;  %s813_s3 = sld [smem:[#allocation6 + $0x107]] }
  0x60   :  { %v171_v12 = vmax.f32 %v170_v6, 0.0  ;;  %v216_v19 = vmul.f32 %v215_v10, %v667_v2  ;;  %v148_v20 = vadd.f32 %v147_v3, %v121_v61  ;;  %v152_v21 = vadd.f32 %v151_v5, %v125_v62  ;;  %s815_s19 = sld [smem:[#allocation6 + $0x187]]  ;;  %s827_s21 = sld [smem:[#allocation6 + $0x8]] }
  0x61   :  { %v197_v22 = vadd.f32 %v196_v63, %v194_v15  ;;  %v220_v23 = vmul.f32 %v219_v11, %v677_v4  ;;  %v213_v26 = vadd.f32 %v212_v18, %v209_v17  ;;  %v235_v27 = vstv %s751_s29  ;;  %s822_s20 = sld [smem:[#allocation7 + $0x7]]  ;;  %s829_s22 = sld [smem:[#allocation6 + $0x88]] }
  0x62   :  { %v174_v24 = vmul.f32 %v173_v13, %v171_v12  ;;  %v178_v25 = vmul.f32 %v177_v14, %v171_v12  ;;  %v204_v29 = vstv %s749_s2  ;;  %v223_v30 = vstv %s754_s30  ;;  %s833_s24 = sld [smem:[#allocation6 + $0x108]]  ;;  %s840_s27 = sld [smem:[#allocation9 + $0x301]] }
  0x63   :  { %v198_v28 = vmax.f32 %v197_v22, 0.0  ;;  %v236_v31 = vmul.f32 %v235_v27, %v663_v0  ;;  %v217_v32 = vadd.f32 %v216_v19, %v213_v26  ;;  %v238_v33 = vstv %s756_s6  ;;  %s835_s25 = sld [smem:[#allocation6 + $0x188]]  ;;  %s852_s2 = sld [smem:[#allocation6 + $0x9]] }
  0x64   :  { %v242_v34 = vstv %s763_s9  ;;  %v246_v35 = vstv %s765_s10  ;;  %v227_v36 = vstv %s767_s11  ;;  %v231_v37 = vstv %s769_s12  ;;  %s838_s26 = sld [smem:[#allocation9 + $0x300]]  ;;  %s855_s29 = sld [smem:[#allocation9 + $0x381]] }
  0x65   :  { %v239_v38 = vmul.f32 %v238_v33, %v665_v1  ;;  %v243_v39 = vmul.f32 %v242_v34, %v667_v2  ;;  %v175_v40 = vadd.f32 %v174_v24, %v148_v20  ;;  %v179_v41 = vadd.f32 %v178_v25, %v152_v21  ;;  %s850_s28 = sld [smem:[#allocation9 + $0x380]]  ;;  %s857_s30 = sld [smem:[#allocation6 + $0x89]] }
  0x66   :  { %v201_v42 = vmul.f32 %v200_v16, %v198_v28  ;;  %v221_v43 = vadd.f32 %v220_v23, %v217_v32  ;;  %v205_v44 = vmul.f32 %v204_v29, %v198_v28  ;;  %v247_v46 = vmul.f32 %v246_v35, %v677_v4  ;;  %s861_s6 = sld [smem:[#allocation6 + $0x109]]  ;;  %s865_s10 = sld [smem:[#allocation7 + $0x8]] }
  0x67   :  { %v240_v45 = vadd.f32 %v239_v38, %v236_v31  ;;  %v250_v47 = vstv %s777_s4  ;;  %v262_v49 = vstv %s779_s23  ;;  %v265_v50 = vstv %s785_s13  ;;  %s863_s9 = sld [smem:[#allocation6 + $0x189]]  ;;  %s877_s11 = sld [smem:[#allocation9 + $0x400]] }
  0x68   :  { %v224_v48 = vadd.f32 %v223_v30, %v221_v43  ;;  %v269_v51 = vstv %s787_s14  ;;  %v263_v53 = vmul.f32 %v262_v49, %v663_v0  ;;  %v266_v54 = vmul.f32 %v265_v50, %v665_v1  ;;  %s879_s12 = sld [smem:[#allocation9 + $0x401]]  ;;  %s469_s23 = sld [smem:[#allocation9 + $0x480]] }
  0x69   :  { %v244_v52 = vadd.f32 %v243_v39, %v240_v45  ;;  %v270_v55 = vmul.f32 %v269_v51, %v667_v2  ;;  %v202_v56 = vadd.f32 %v201_v42, %v175_v40  ;;  %v254_v58 = vstv %s791_s15  ;;  %s882_s4 = sld [smem:[#allocation7 + $0x9]]  ;;  %s592_s14 = smov [#allocation12]  }
  0x6a   :  { %v225_v57 = vmax.f32 %v224_v48, 0.0  ;;  %v273_v59 = vstv %s793_s16  ;;  %v206_v60 = vadd.f32 %v205_v44, %v179_v41  ;;  %v267_v62 = vadd.f32 %v266_v54, %v263_v53  ;;  %s470_s13 = sld [smem:[#allocation9 + $0x481]]  ;;  %s384_s15 = sshll.u32 %s592_s14, 4  ;;  %s385_s15 = int_to_ptr.vmem [resolvable:$true] %s384_s15 }
  0x6b   :  { %v248_v61 = vadd.f32 %v247_v46, %v244_v52  ;;  %v274_v63 = vmul.f32 %v273_v59, %v677_v4  ;;  %v289_v6 = vstv %s801_s17  ;;  %v292_v7 = vstv %s803_s18  ;;  %s553_s16 = scalar_lea.vmem %s385_s15, 256  ;;  %p558_p1 = scmp.lt.s32.totalorder %s385_s15, %s385_s15 }
  0x6c   :  { %v228_v3 = vmul.f32 %v227_v36, %v225_v57  ;;  %v232_v5 = vmul.f32 %v231_v37, %v225_v57  ;;  %v271_v9 = vadd.f32 %v270_v55, %v267_v62  ;;  %v290_v10 = vmul.f32 %v289_v6, %v663_v0  ;;  %p554_p0 = scmp.ne.s32.totalorder %s385_s15, %s553_s16  ;;  %p559_p2 = scmp.lt.s32.totalorder %s553_s16, %s553_s16 }
  0x6d   :  { %v251_v8 = vadd.f32 %v250_v47, %v248_v61  ;;  %v293_v11 = vmul.f32 %v292_v7, %v665_v1  ;;  %v258_v12 = vstv %s809_s0  ;;  %v277_v13 = vstv %s811_s1 }
  0x6e   :  { %v296_v14 = vstv %s813_s3  ;;  %v300_v15 = vstv %s815_s19  ;;  %v275_v17 = vadd.f32 %v274_v63, %v271_v9  ;;  %v229_v20 = vadd.f32 %v228_v3, %v202_v56  ;;  %p560_p3 = por %p559_p2, %p558_p1 }
  0x6f   :  { %v252_v16 = vmax.f32 %v251_v8, 0.0  ;;  %v294_v18 = vadd.f32 %v293_v11, %v290_v10  ;;  %v297_v19 = vmul.f32 %v296_v14, %v667_v2  ;;  %v233_v21 = vadd.f32 %v232_v5, %v206_v60 }
  0x70   :  { %v301_v22 = vmul.f32 %v300_v15, %v677_v4  ;;  %v304_v23 = vstv %s822_s20  ;;  %v278_v26 = vadd.f32 %v277_v13, %v275_v17  ;;  %v316_v28 = vstv %s827_s21  ;;  %p561_p4 = pnand %p560_p3, %p554_p0 }
  0x71   :  { %v255_v24 = vmul.f32 %v254_v58, %v252_v16  ;;  %v259_v25 = vmul.f32 %v258_v12, %v252_v16  ;;  %v298_v27 = vadd.f32 %v297_v19, %v294_v18  ;;  %v319_v29 = vstv %s829_s22 }
  0x72   :  { %v323_v30 = vstv %s833_s24  ;;  %v327_v31 = vstv %s835_s25  ;;  %v279_v32 = vmax.f32 %v278_v26, 0.0  ;;  %v281_v33 = vstv %s838_s26 }
  0x73   :  { %v285_v34 = vstv %s840_s27  ;;  %v302_v35 = vadd.f32 %v301_v22, %v298_v27  ;;  %v317_v36 = vmul.f32 %v316_v28, %v663_v0  ;;  %v320_v37 = vmul.f32 %v319_v29, %v665_v1 }
  0x74   :  { %v324_v38 = vmul.f32 %v323_v30, %v667_v2  ;;  %v256_v39 = vadd.f32 %v255_v24, %v229_v20  ;;  %v260_v40 = vadd.f32 %v259_v25, %v233_v21  ;;  %v328_v42 = vmul.f32 %v327_v31, %v677_v4 }
  0x75   :  { %v305_v41 = vadd.f32 %v304_v23, %v302_v35  ;;  %v282_v43 = vmul.f32 %v281_v33, %v279_v32  ;;  %v286_v44 = vmul.f32 %v285_v34, %v279_v32  ;;  %v321_v45 = vadd.f32 %v320_v37, %v317_v36 }
  0x76   :  { %v343_v46 = vstv %s852_s2  ;;  %v308_v48 = vstv %s850_s28  ;;  %v312_v49 = vstv %s855_s29  ;;  %v346_v52 = vstv %s857_s30 }
  0x77   :  { %v306_v47 = vmax.f32 %v305_v41, 0.0  ;;  %v344_v50 = vmul.f32 %v343_v46, %v663_v0  ;;  %v325_v51 = vadd.f32 %v324_v38, %v321_v45  ;;  %v350_v53 = vstv %s861_s6 }
  0x78   :  { %v354_v54 = vstv %s863_s9  ;;  %v331_v55 = vstv %s865_s10  ;;  %v347_v56 = vmul.f32 %v346_v52, %v665_v1  ;;  %v351_v57 = vmul.f32 %v350_v53, %v667_v2 }
  0x79   :  { %v283_v58 = vadd.f32 %v282_v43, %v256_v39  ;;  %v287_v59 = vadd.f32 %v286_v44, %v260_v40  ;;  %v329_v60 = vadd.f32 %v328_v42, %v325_v51  ;;  %v309_v61 = vmul.f32 %v308_v48, %v306_v47 }
  0x7a   :  { %v313_v62 = vmul.f32 %v312_v49, %v306_v47  ;;  %v348_v0 = vadd.f32 %v347_v56, %v344_v50  ;;  %v355_v63 = vmul.f32 %v354_v54, %v677_v4  ;;  %v335_v5 = vstv %s877_s11 }
  0x7b   :  { %v332_v3 = vadd.f32 %v331_v55, %v329_v60  ;;  %v339_v6 = vstv %s879_s12  ;;  %v358_v9 = vstv %s882_s4  ;;  %v310_v1 = vadd.f32 %v309_v61, %v283_v58 }
  0x7c   :  { %v352_v7 = vadd.f32 %v351_v57, %v348_v0  ;;  %v314_v10 = vadd.f32 %v313_v62, %v287_v59  ;;  %v362_v14 = vstv %s469_s23  ;;  %v366_v15 = vstv %s470_s13 }
  0x7d   :  { %v333_v8 = vmax.f32 %v332_v3, 0.0 }
  0x7e   :  { %v356_v11 = vadd.f32 %v355_v63, %v352_v7 }
  0x7f   :  { %v336_v2 = vmul.f32 %v335_v5, %v333_v8  ;;  %v340_v12 = vmul.f32 %v339_v6, %v333_v8 }
  0x80   :  { %v359_v13 = vadd.f32 %v358_v9, %v356_v11 }
  0x81   :  { %v337_v16 = vadd.f32 %v336_v2, %v310_v1  ;;  %v341_v17 = vadd.f32 %v340_v12, %v314_v10 }
  0x82   :  { %v360_v18 = vmax.f32 %v359_v13, 0.0 }
  0x84   :  { %v363_v19 = vmul.f32 %v362_v14, %v360_v18  ;;  %v367_v20 = vmul.f32 %v366_v15, %v360_v18 }
  0x86   :  { %v364_v4 = vadd.f32 %v363_v19, %v337_v16  ;;  %v368_v21 = vadd.f32 %v367_v20, %v341_v17 }
  0x88   :  { %v369_v22 = vsub.f32 %v368_v21, %v364_v4 }
  0x8a   :  { %v370_v23 = vmul.f32 1.442695, %v369_v22 }
  0x8c   :  { %479 = vpow2.f32 %v370_v23 }
  0x96   :  { %v480_v24 = vpop.eup %479 }
  0x97   :  { %v372_v25 = vadd.f32 1.0, %v480_v24 }
  0x99   :  { %481 = vrcp.f32 %v372_v25 }
  0xa3   :  { %v482_v26 = vpop.eup %481 }
  0xa4   :  { %375 = vst [vmem:[#allocation12] sm:$0xff] %v482_v26  ;;  %v376_v27 = vsub.f32 1.0, %v482_v26 }
  0xa6   :  { %378 = vst [vmem:[#allocation12 + $0x8] sm:$0xff] %v376_v27 }
  0xa7   :  { %564 = shalt.err (!%p561_p4)
}
  0xa8   :  { %s565_s0 = scalar_lea.hbm %s917_s5, 256 }
  0xa9   :  { %p566_p5 = scmp.ne.s32.totalorder %s917_s5, %s565_s0  ;;  %p569_p6 = scmp.lt.u32.totalorder %s565_s0, %s917_s5 }
  0xab   :  { %p571_p7 = pnand %p569_p6, %p566_p5 }
  0xad   :  { %574 = shalt.err (!%p571_p7)
}
  0xae   :  { %390 = dma.vmem_to_hbm [thread:$0]  %s385_s15, 256, %s917_s5, [#allocation4], %s587_s7, %s587_s7, %s588_s8  }
  0xaf   :  { %583 = dma.done.wait [#allocation4], 256  }
  0xb0   :  { %584 = vsyncadd [#allocation4], 4294967040 }
  0xb1   :  { %394 = vsyncpa [#allocation3], 1 }
  0xb2   :  { %395 = vsyncpa [#allocation4], 1 }
  0xb3   :  { %396 = vsyncpa [#allocation5], 1 }
  0xb4   :  { %397 = vsyncpa [#allocation8], 1 }
  0xb5   :  { %398 = vsyncpa [#allocation11], 1 }

</bundles_post_ra>
